<compile_context>
chip_gen: v6e
topology: v6e:2x2x1
jax: 0.10.0
libtpu: 0.0.40
codegen_flags: <defaults>
</compile_context>

<pallas_src>
import jax
import jax.numpy as jnp
from jax.experimental import pallas as pl
from jax.experimental.pallas import tpu as pltpu

NEG_MAX_F32 = float(-jnp.finfo(jnp.float32).max)


def _pick_tile(n, max_tile):
    """Largest lane-aligned (multiple-of-128) tile <= max_tile dividing n, else n."""
    if n <= max_tile:
        return n
    t = (max_tile // 128) * 128
    while t >= 128:
        if n % t == 0:
            return t
        t -= 128
    return n


# ----------------------------------------------------------------------------
# Kernel 1: GroupNorm statistics (32 groups, eps=1e-6) folded with the affine
# params into per-(stream, batch, channel) scale/shift, so normalization can be
# fused into the attention kernel (saves a full HBM write+read per stream).
# ----------------------------------------------------------------------------
def groupnorm_scale_shift(x_st, gamma, beta, *, num_groups=32, eps=1e-6):
    S, B, C, N = x_st.shape
    G = num_groups
    cg = C // G

    def kernel(x_ref, g_ref, b_ref, scale_ref, shift_ref):
        xv = x_ref[...]                                   # (C, N) f32
        xg = xv.reshape(G, cg, N)                         # N stays on lanes
        # single-pass stats: reduce lanes first, then sublanes
        m1 = jnp.mean(xg, axis=2, keepdims=True)          # (G, cg, 1)
        m2 = jnp.mean(xg * xg, axis=2, keepdims=True)
        mean = jnp.mean(m1, axis=1, keepdims=True)        # (G, 1, 1)
        ex2 = jnp.mean(m2, axis=1, keepdims=True)
        var = jnp.maximum(ex2 - mean * mean, 0.0)
        rstd = jax.lax.rsqrt(var + eps)
        mean_c = jnp.broadcast_to(mean, (G, cg, 1)).reshape(C, 1)
        rstd_c = jnp.broadcast_to(rstd, (G, cg, 1)).reshape(C, 1)
        scale = g_ref[...] * rstd_c                       # gamma * rstd
        scale_ref[...] = scale
        shift_ref[...] = b_ref[...] - mean_c * scale      # beta - mean*gamma*rstd

    return pl.pallas_call(
        kernel,
        out_shape=(jax.ShapeDtypeStruct((S, B, C, 1), jnp.float32),
                   jax.ShapeDtypeStruct((S, B, C, 1), jnp.float32)),
        grid=(S, B),
        in_specs=[
            pl.BlockSpec((None, None, C, N), lambda s, b: (s, b, 0, 0)),
            pl.BlockSpec((C, 1), lambda s, b: (0, 0)),
            pl.BlockSpec((C, 1), lambda s, b: (0, 0)),
        ],
        out_specs=[
            pl.BlockSpec((None, None, C, 1), lambda s, b: (s, b, 0, 0)),
            pl.BlockSpec((None, None, C, 1), lambda s, b: (s, b, 0, 0)),
        ],
        compiler_params=pltpu.CompilerParams(
            dimension_semantics=("parallel", "parallel")),
    )(x_st, gamma.reshape(C, 1), beta.reshape(C, 1))


# ----------------------------------------------------------------------------
# Kernel 2: fused (GroupNorm -> fg/bg masking -> q/k/v proj -> masked flash
# attention with online softmax -> out proj) for BOTH streams.
#   layout: channels on sublanes, tokens on lanes; sim kept as (h, kv, q) so
#   all softmax broadcasts/reductions stay in a token-on-lanes layout and the
#   (h, d, q) accumulator reshapes to the lane-dense (C, q) output for free.
# ----------------------------------------------------------------------------
def fused_norm_cross_attention(x_st, gn_scale, gn_shift, mask_row, mask_col,
                               wq, wk, wv, wo, bo, *, heads, dim_head,
                               max_q_tile=256, max_kv_tile=256):
    S, B, C, N = x_st.shape
    assert heads * dim_head == C
    q_t = _pick_tile(N, max_q_tile)
    kv_t = _pick_tile(N, max_kv_tile)
    nq, nkv = N // q_t, N // kv_t

    def kernel(xq_ref, xkv_ref, sc_ref, sh_ref, mq_ref, mkr_ref, mkc_ref,
               wq_ref, wk_ref, wv_ref, wo_ref, bo_ref, o_ref,
               q_sc, m_sc, l_sc, acc_sc):
        ki = pl.program_id(3)

        @pl.when(ki == 0)
        def _init():
            # fused GroupNorm (precomputed scale/shift), foreground mask, q proj
            xqn = xq_ref[...] * sc_ref[...] + sh_ref[...]              # (C, q_t) f32
            fg = (xqn * mq_ref[...]).astype(jnp.bfloat16)
            q = jnp.dot(wq_ref[...], fg, preferred_element_type=jnp.float32)
            q_sc[...] = q.reshape(heads, dim_head, q_t).astype(jnp.bfloat16)
            m_sc[...] = jnp.full_like(m_sc, -jnp.inf)
            l_sc[...] = jnp.zeros_like(l_sc)
            acc_sc[...] = jnp.zeros_like(acc_sc)

        # current kv tile: fused norm, background mask, k/v projections
        xkn = xkv_ref[...] * sc_ref[...] + sh_ref[...]                 # (C, kv_t)
        bg = (xkn * (1.0 - mkr_ref[...])).astype(jnp.bfloat16)
        k = jnp.dot(wk_ref[...], bg, preferred_element_type=jnp.float32)
        v = jnp.dot(wv_ref[...], bg, preferred_element_type=jnp.float32)
        kh = k.reshape(heads, dim_head, kv_t).astype(jnp.bfloat16)
        vh = v.reshape(heads, dim_head, kv_t).astype(jnp.bfloat16)
        qh = q_sc[...]                                                 # (h, d, q_t)

        # sim^T = (h, kv_t, q_t); softmax scale pre-folded into Wq in the wrapper
        sim = jax.lax.dot_general(kh, qh, (((1,), (1,)), ((0,), (0,))),
                                  preferred_element_type=jnp.float32)
        masked = mkc_ref[...].astype(jnp.int32) != 0                   # .int().bool()
        sim = jnp.where(masked[None, :, :], NEG_MAX_F32, sim)

        # online softmax over kv (sublane reduction; q stays on lanes)
        m_prev = m_sc[...]
        m_cur = jnp.max(sim, axis=1, keepdims=True)                    # (h, 1, q_t)
        m_new = jnp.maximum(m_prev, m_cur)
        alpha = jnp.exp(m_prev - m_new)
        p = jnp.exp(sim - m_new)                                       # (h, kv_t, q_t)
        l_sc[...] = alpha * l_sc[...] + jnp.sum(p, axis=1, keepdims=True)
        pv = jax.lax.dot_general(vh, p.astype(jnp.bfloat16),
                                 (((2,), (1,)), ((0,), (0,))),
                                 preferred_element_type=jnp.float32)   # (h, d, q_t)
        acc_sc[...] = alpha * acc_sc[...] + pv
        m_sc[...] = m_new

        @pl.when(ki == nkv - 1)
        def _finalize():
            inv_l = pl.reciprocal(l_sc[...], approx=True)              # EUP divide
            att = (acc_sc[...] * inv_l).reshape(C, q_t)                # lane-dense
            o_ref[...] = (jnp.dot(wo_ref[...], att.astype(jnp.bfloat16),
                                  preferred_element_type=jnp.float32)
                          + bo_ref[...])

    return pl.pallas_call(
        kernel,
        out_shape=jax.ShapeDtypeStruct((S, B, C, N), jnp.float32),
        grid=(S, B, nq, nkv),
        in_specs=[
            pl.BlockSpec((None, None, C, q_t), lambda s, b, qi, ki: (s, b, 0, qi)),
            pl.BlockSpec((None, None, C, kv_t), lambda s, b, qi, ki: (s, b, 0, ki)),
            pl.BlockSpec((None, None, C, 1), lambda s, b, qi, ki: (s, b, 0, 0)),
            pl.BlockSpec((None, None, C, 1), lambda s, b, qi, ki: (s, b, 0, 0)),
            pl.BlockSpec((None, 1, q_t), lambda s, b, qi, ki: (b, 0, qi)),
            pl.BlockSpec((None, 1, kv_t), lambda s, b, qi, ki: (b, 0, ki)),
            pl.BlockSpec((None, kv_t, 1), lambda s, b, qi, ki: (b, ki, 0)),
            pl.BlockSpec((None, C, C), lambda s, b, qi, ki: (s, 0, 0)),
            pl.BlockSpec((None, C, C), lambda s, b, qi, ki: (s, 0, 0)),
            pl.BlockSpec((None, C, C), lambda s, b, qi, ki: (s, 0, 0)),
            pl.BlockSpec((None, C, C), lambda s, b, qi, ki: (s, 0, 0)),
            pl.BlockSpec((None, C, 1), lambda s, b, qi, ki: (s, 0, 0)),
        ],
        out_specs=pl.BlockSpec((None, None, C, q_t),
                               lambda s, b, qi, ki: (s, b, 0, qi)),
        scratch_shapes=[
            pltpu.VMEM((heads, dim_head, q_t), jnp.bfloat16),   # q (per q tile)
            pltpu.VMEM((heads, 1, q_t), jnp.float32),           # running max
            pltpu.VMEM((heads, 1, q_t), jnp.float32),           # running sum
            pltpu.VMEM((heads, dim_head, q_t), jnp.float32),    # output accum
        ],
        compiler_params=pltpu.CompilerParams(
            dimension_semantics=("parallel", "parallel", "parallel", "arbitrary"),
            vmem_limit_bytes=64 * 1024 * 1024),
    )(x_st, x_st, gn_scale, gn_shift, mask_row, mask_row, mask_col,
      wq, wk, wv, wo, bo)


# ----------------------------------------------------------------------------
# Kernel 3: fc (Conv1d k=1 on the channel concat, done as two dots on the split
# weight), conv1 (1x1 Conv2d), and the mask blend — gridded over (B, N tiles),
# everything in the lane-dense (C, n) layout.
# ----------------------------------------------------------------------------
def fuse_project_blend(att, ori, mask_row, wfc_a, wfc_u, bfc, wc1, bc1,
                       *, max_n_tile=512):
    S, B, C, N = att.shape
    nt = _pick_tile(N, max_n_tile)

    def kernel(a_ref, u_ref, ori_ref, m_ref,
               wfa_ref, wfu_ref, bfc_ref, wc1_ref, bc1_ref, o_ref):
        a = a_ref[...].astype(jnp.bfloat16)                           # (C, nt)
        u = u_ref[...].astype(jnp.bfloat16)
        y = (jnp.dot(wfa_ref[...], a, preferred_element_type=jnp.float32)
             + jnp.dot(wfu_ref[...], u, preferred_element_type=jnp.float32)
             + bfc_ref[...])
        z = jnp.dot(wc1_ref[...], y.astype(jnp.bfloat16),
                    preferred_element_type=jnp.float32) + bc1_ref[...]
        m = m_ref[...]                                                # (1, nt)
        o_ref[...] = z * m + ori_ref[...] * (1.0 - m)

    return pl.pallas_call(
        kernel,
        out_shape=jax.ShapeDtypeStruct((B, C, N), jnp.float32),
        grid=(B, N // nt),
        in_specs=[
            pl.BlockSpec((None, None, C, nt), lambda b, t: (0, b, 0, t)),  # adapter
            pl.BlockSpec((None, None, C, nt), lambda b, t: (1, b, 0, t)),  # unet
            pl.BlockSpec((None, C, nt), lambda b, t: (b, 0, t)),
            pl.BlockSpec((None, 1, nt), lambda b, t: (b, 0, t)),
            pl.BlockSpec((C, C), lambda b, t: (0, 0)),
            pl.BlockSpec((C, C), lambda b, t: (0, 0)),
            pl.BlockSpec((C, 1), lambda b, t: (0, 0)),
            pl.BlockSpec((C, C), lambda b, t: (0, 0)),
            pl.BlockSpec((C, 1), lambda b, t: (0, 0)),
        ],
        out_specs=pl.BlockSpec((None, C, nt), lambda b, t: (b, 0, t)),
        compiler_params=pltpu.CompilerParams(
            dimension_semantics=("parallel", "parallel")),
    )(att, att, ori, mask_row, wfc_a, wfc_u, bfc, wc1, bc1)


# ----------------------------------------------------------------------------
# Glue: nearest-neighbor resize (matches F.interpolate mode='nearest') + clamp
# ----------------------------------------------------------------------------
def nearest_resize(x, oh, ow):
    B, C, H, W = x.shape
    hi = jnp.floor(jnp.arange(oh) * (H / oh)).astype(jnp.int32)
    wi = jnp.floor(jnp.arange(ow) * (W / ow)).astype(jnp.int32)
    return x[:, :, hi][:, :, :, wi]


# ----------------------------------------------------------------------------
# Full forward pass
# ----------------------------------------------------------------------------
def cross_attention_interaction(adapter_feature, unet_feature, fg_mask, params,
                                *, n_heads, d_head):
    B, C, H, W = adapter_feature.shape
    assert H == W, "module's flatten/repeat/reshape implies square spatial"
    assert n_heads * d_head == C
    N = H * W

    # layout glue (reshapes are free; the stack is one small HBM pass that lets
    # a single kernel launch cover both streams)
    x_st = jnp.stack([adapter_feature.reshape(B, C, N),
                      unet_feature.reshape(B, C, N)], axis=0)        # (2,B,C,N)
    mask_ds = jnp.clip(nearest_resize(fg_mask, H, W), 0.0, 1.0)      # (B,1,H,W)
    mask_row = mask_ds.reshape(B, 1, N)
    mask_col = jnp.transpose(mask_row, (0, 2, 1))                    # (B,N,1)

    # GroupNorm stats shared by both streams (Pallas kernel 1)
    gn_scale, gn_shift = groupnorm_scale_shift(
        x_st, params["gn_gamma"], params["gn_beta"], num_groups=32, eps=1e-6)

    # stacked per-stream attention weights, bf16 for MXU + half the weight DMA;
    # softmax scale folded into Wq
    sm_scale = float(d_head) ** (-0.5)

    def stack_w(i):
        return jnp.stack([params["att1"][i], params["att2"][i]])

    wq = (stack_w(0) * sm_scale).astype(jnp.bfloat16)
    wk = stack_w(1).astype(jnp.bfloat16)
    wv = stack_w(2).astype(jnp.bfloat16)
    wo = stack_w(3).astype(jnp.bfloat16)
    bo = stack_w(4).reshape(2, C, 1)                                 # f32 bias

    # fused GroupNorm + masked flash cross-attention, both streams (kernel 2)
    att = fused_norm_cross_attention(
        x_st, gn_scale, gn_shift, mask_row, mask_col, wq, wk, wv, wo, bo,
        heads=n_heads, dim_head=d_head)                              # (2,B,C,N)

    # fc + conv1 + mask blend (kernel 3); torch's .repeat(1,1,h*h/N) is a no-op
    out = fuse_project_blend(
        att, adapter_feature.reshape(B, C, N), mask_row,
        params["w_fc_a"].astype(jnp.bfloat16),
        params["w_fc_u"].astype(jnp.bfloat16),
        params["b_fc"].reshape(C, 1),
        params["w_c1"].astype(jnp.bfloat16),
        params["b_c1"].reshape(C, 1))                                # (B,C,N)

    return out.reshape(B, C, H, W)


# ----------------------------------------------------------------------------
# Deterministic synthetic parameter init (weights stored as (out, in); kernels
# compute W @ x_cn on channel-major tiles; the fc weight is pre-split into its
# adapter / unet input halves). Synthetic init, not a checkpoint load.
# ----------------------------------------------------------------------------
def init_params(key, inner_dim):
    C = inner_dim
    ks = jax.random.split(key, 17)

    def w(k, shape, s=0.05):
        return (jax.random.normal(k, shape) * s).astype(jnp.float32)

    def attn_params(k0, k1, k2, k3, k4):
        return (w(k0, (C, C)), w(k1, (C, C)), w(k2, (C, C)),
                w(k3, (C, C)), w(k4, (C,)))

    return {
        "gn_gamma": (1.0 + 0.1 * jax.random.normal(ks[0], (C,))).astype(jnp.float32),
        "gn_beta": (0.1 * jax.random.normal(ks[1], (C,))).astype(jnp.float32),
        "att1": attn_params(ks[2], ks[3], ks[4], ks[5], ks[6]),
        "att2": attn_params(ks[7], ks[8], ks[9], ks[10], ks[11]),
        "w_fc_a": w(ks[12], (C, C)),   # fc weight columns acting on adapter stream
        "w_fc_u": w(ks[13], (C, C)),   # fc weight columns acting on unet stream
        "b_fc": w(ks[14], (C,)),
        "w_c1": w(ks[15], (C, C)),
        "b_c1": w(ks[16], (C,)),
    }


if __name__ == "__main__":
    # small shapes: heads=2, dim_head=16 -> inner_dim=32 (divisible by 32 groups)
    n_heads, d_head = 2, 16
    inner_dim = n_heads * d_head
    B, H, W = 2, 8, 8

    root = jax.random.PRNGKey(0)
    k_p, k_a, k_u, k_m = jax.random.split(root, 4)
    params = init_params(k_p, inner_dim)

    adapter_feature = jax.random.normal(k_a, (B, inner_dim, H, W), jnp.float32)
    unet_feature = jax.random.normal(k_u, (B, inner_dim, H, W), jnp.float32)
    # mask at higher res; values in [0, 2) so clamp + .int().bool() are exercised
    fg_mask = jax.random.uniform(k_m, (B, 1, 16, 16), jnp.float32, 0.0, 2.0)

    out = cross_attention_interaction(adapter_feature, unet_feature, fg_mask,
                                      params, n_heads=n_heads, d_head=d_head)
    out = jax.block_until_ready(out)
    assert out.shape == (B, inner_dim, H, W)
    assert bool(jnp.all(jnp.isfinite(out)))
    print("KERNEL_OK")
</pallas_src>

<mosaic_0001>
module attributes {stable_mosaic.version = 11 : i64} {
  func.func @kernel(%arg0: i32, %arg1: i32, %arg2: memref<1x1x32x64xf32, #tpu.memory_space<vmem>>, %arg3: memref<32x1xf32, #tpu.memory_space<vmem>>, %arg4: memref<32x1xf32, #tpu.memory_space<vmem>>, %arg5: memref<1x1x32x1xf32, #tpu.memory_space<vmem>>, %arg6: memref<1x1x32x1xf32, #tpu.memory_space<vmem>>) attributes {dimension_semantics = [#tpu.dimension_semantics<parallel>, #tpu.dimension_semantics<parallel>], iteration_bounds = array<i64: 2, 2>, scalar_prefetch = 0 : i64, scratch_operands = 0 : i64, tpu.core_type = #tpu.core_type<tc>, window_params = [{transform_indices = @transform_0, window_bounds = array<i64: 1, 1, 32, 64>}, {pipeline_mode = #tpu.pipeline_mode<synchronous>, transform_indices = @transform_1, window_bounds = array<i64: 32, 1>}, {pipeline_mode = #tpu.pipeline_mode<synchronous>, transform_indices = @transform_2, window_bounds = array<i64: 32, 1>}, {transform_indices = @transform_3, window_bounds = array<i64: 1, 1, 32, 1>}, {transform_indices = @transform_4, window_bounds = array<i64: 1, 1, 32, 1>}]} {
    %c0 = arith.constant 0 : index
    %c0_0 = arith.constant 0 : index
    %c0_1 = arith.constant 0 : index
    %c0_2 = arith.constant 0 : index
    %0 = vector.load %arg2[%c0, %c0_0, %c0_1, %c0_2] : memref<1x1x32x64xf32, #tpu.memory_space<vmem>>, vector<1x1x32x64xf32>
    %1 = vector.shape_cast %0 : vector<1x1x32x64xf32> to vector<32x64xf32>
    %2 = vector.shape_cast %1 : vector<32x64xf32> to vector<32x1x64xf32>
    %cst = arith.constant dense<0.000000e+00> : vector<32x1xf32>
    %3 = vector.multi_reduction <add>, %2, %cst [2] : vector<32x1x64xf32> to vector<32x1xf32>
    %4 = vector.shape_cast %3 : vector<32x1xf32> to vector<32x1x1xf32>
    %cst_3 = arith.constant 6.400000e+01 : f32
    %5 = vector.broadcast %cst_3 : f32 to vector<32x1x1xf32>
    %6 = arith.divf %4, %5 : vector<32x1x1xf32>
    %7 = arith.mulf %2, %2 : vector<32x1x64xf32>
    %cst_4 = arith.constant dense<0.000000e+00> : vector<32x1xf32>
    %8 = vector.multi_reduction <add>, %7, %cst_4 [2] : vector<32x1x64xf32> to vector<32x1xf32>
    %9 = vector.shape_cast %8 : vector<32x1xf32> to vector<32x1x1xf32>
    %cst_5 = arith.constant 6.400000e+01 : f32
    %10 = vector.broadcast %cst_5 : f32 to vector<32x1x1xf32>
    %11 = arith.divf %9, %10 : vector<32x1x1xf32>
    %cst_6 = arith.constant dense<0.000000e+00> : vector<32x1xf32>
    %12 = vector.multi_reduction <add>, %6, %cst_6 [1] : vector<32x1x1xf32> to vector<32x1xf32>
    %13 = vector.shape_cast %12 : vector<32x1xf32> to vector<32x1x1xf32>
    %cst_7 = arith.constant 1.000000e+00 : f32
    %14 = vector.broadcast %cst_7 : f32 to vector<32x1x1xf32>
    %15 = arith.divf %13, %14 : vector<32x1x1xf32>
    %cst_8 = arith.constant dense<0.000000e+00> : vector<32x1xf32>
    %16 = vector.multi_reduction <add>, %11, %cst_8 [1] : vector<32x1x1xf32> to vector<32x1xf32>
    %17 = vector.shape_cast %16 : vector<32x1xf32> to vector<32x1x1xf32>
    %cst_9 = arith.constant 1.000000e+00 : f32
    %18 = vector.broadcast %cst_9 : f32 to vector<32x1x1xf32>
    %19 = arith.divf %17, %18 : vector<32x1x1xf32>
    %20 = arith.mulf %15, %15 : vector<32x1x1xf32>
    %21 = arith.subf %19, %20 : vector<32x1x1xf32>
    %cst_10 = arith.constant 0.000000e+00 : f32
    %22 = vector.broadcast %cst_10 : f32 to vector<32x1x1xf32>
    %23 = arith.maximumf %21, %22 : vector<32x1x1xf32>
    %cst_11 = arith.constant 9.99999997E-7 : f32
    %24 = vector.broadcast %cst_11 : f32 to vector<32x1x1xf32>
    %25 = arith.addf %23, %24 : vector<32x1x1xf32>
    %26 = math.rsqrt %25 : vector<32x1x1xf32>
    %27 = vector.shape_cast %15 : vector<32x1x1xf32> to vector<32x1xf32>
    %28 = vector.shape_cast %26 : vector<32x1x1xf32> to vector<32x1xf32>
    %c0_12 = arith.constant 0 : index
    %c0_13 = arith.constant 0 : index
    %29 = vector.load %arg3[%c0_12, %c0_13] : memref<32x1xf32, #tpu.memory_space<vmem>>, vector<32x1xf32>
    %30 = arith.mulf %29, %28 : vector<32x1xf32>
    %c0_14 = arith.constant 0 : index
    %c0_15 = arith.constant 0 : index
    %c0_16 = arith.constant 0 : index
    %c0_17 = arith.constant 0 : index
    %31 = vector.load %arg5[%c0_14, %c0_15, %c0_16, %c0_17] : memref<1x1x32x1xf32, #tpu.memory_space<vmem>>, vector<1x1x32x1xf32>
    %32 = vector.shape_cast %31 : vector<1x1x32x1xf32> to vector<32x1xf32>
    %33 = vector.shape_cast %30 : vector<32x1xf32> to vector<1x1x32x1xf32>
    tpu.vector_store %arg5[%c0_14, %c0_15, %c0_16, %c0_17], %33 {strides = array<i32>} : memref<1x1x32x1xf32, #tpu.memory_space<vmem>>, vector<1x1x32x1xf32>,
    %c0_18 = arith.constant 0 : index
    %c0_19 = arith.constant 0 : index
    %34 = vector.load %arg4[%c0_18, %c0_19] : memref<32x1xf32, #tpu.memory_space<vmem>>, vector<32x1xf32>
    %35 = arith.mulf %27, %30 : vector<32x1xf32>
    %36 = arith.subf %34, %35 : vector<32x1xf32>
    %c0_20 = arith.constant 0 : index
    %c0_21 = arith.constant 0 : index
    %c0_22 = arith.constant 0 : index
    %c0_23 = arith.constant 0 : index
    %37 = vector.load %arg6[%c0_20, %c0_21, %c0_22, %c0_23] : memref<1x1x32x1xf32, #tpu.memory_space<vmem>>, vector<1x1x32x1xf32>
    %38 = vector.shape_cast %37 : vector<1x1x32x1xf32> to vector<32x1xf32>
    %39 = vector.shape_cast %36 : vector<32x1xf32> to vector<1x1x32x1xf32>
    tpu.vector_store %arg6[%c0_20, %c0_21, %c0_22, %c0_23], %39 {strides = array<i32>} : memref<1x1x32x1xf32, #tpu.memory_space<vmem>>, vector<1x1x32x1xf32>,
    return
  }
  func.func @transform_0(%arg0: i32, %arg1: i32) -> (i32, i32, i32, i32) {
    %c0_i32 = arith.constant 0 : i32
    %c0_i32_0 = arith.constant 0 : i32
    %c0_i32_1 = arith.constant 0 : i32
    return %arg0, %arg1, %c0_i32, %c0_i32_0 : i32, i32, i32, i32
  }
  func.func @transform_1(%arg0: i32, %arg1: i32) -> (i32, i32) {
    %c0_i32 = arith.constant 0 : i32
    %c0_i32_0 = arith.constant 0 : i32
    %c0_i32_1 = arith.constant 0 : i32
    return %c0_i32, %c0_i32_0 : i32, i32
  }
  func.func @transform_2(%arg0: i32, %arg1: i32) -> (i32, i32) {
    %c0_i32 = arith.constant 0 : i32
    %c0_i32_0 = arith.constant 0 : i32
    %c0_i32_1 = arith.constant 0 : i32
    return %c0_i32, %c0_i32_0 : i32, i32
  }
  func.func @transform_3(%arg0: i32, %arg1: i32) -> (i32, i32, i32, i32) {
    %c0_i32 = arith.constant 0 : i32
    %c0_i32_0 = arith.constant 0 : i32
    %c0_i32_1 = arith.constant 0 : i32
    return %arg0, %arg1, %c0_i32, %c0_i32_0 : i32, i32, i32, i32
  }
  func.func @transform_4(%arg0: i32, %arg1: i32) -> (i32, i32, i32, i32) {
    %c0_i32 = arith.constant 0 : i32
    %c0_i32_0 = arith.constant 0 : i32
    %c0_i32_1 = arith.constant 0 : i32
    return %arg0, %arg1, %c0_i32, %c0_i32_0 : i32, i32, i32, i32
  }
}

</mosaic_0001>

<bundles_post_ra>
// kernel: tpu_custom_call.1
= control target key start
LH: loop header
LB: loop body
LE: loop exit
PB: predicated region body
PF: predicated region fallthrough
CT: control target
= control target key end

     0   :  { %10 = vsyncpa [#allocation3], 0  ;;  %s2496_s0 = inlined_call_operand.hbm [shape: f32[2,2,32,64], index: 0, kind: input, shape index: {}]   ;;  %s2497_s1 = inlined_call_operand.vmem [shape: f32[32,1], index: 1, kind: input, shape index: {}]   ;;  %s2498_s2 = inlined_call_operand.vmem [shape: f32[32,1], index: 2, kind: input, shape index: {}]   ;;  %s2499_s3 = inlined_call_operand.vmem [shape: f32[2,2,32,1], index: 3, kind: output, shape index: {0}]   ;;  %s2500_s4 = inlined_call_operand.vmem [shape: f32[2,2,32,1], index: 4, kind: output, shape index: {1}]  }
   0x1   :  { %12 = vsyncpa [#allocation3 + $0x1], 0  ;;  %s1768_s15 = smov 0   ;;  %s1770_s16 = smov 0  }
   0x2   :  { %s1772_s17 = smov 0   ;;  %s1774_s18 = smov 0  }
   0x3   :  { %s1776_s19 = smov 0   ;;  %s1778_s20 = smov 0  }
   0x4   :  { %s1780_s21 = smov 0   ;;  %s1782_s22 = smov 0  }
   0x5 LB: > { %s1483_s23 = sadd.s32 4294967295, %s1737_s22   ;;  %s27_s24 = sadd.s32 1, %s1729_s20  ;;  %s1737_s22 = sphi %s1782_s22, %s18_s22   ;;  %s1733_s21 = sphi %s1780_s21, %s2513_s21   ;;  %s1729_s20 = sphi %s1778_s20, %s2512_s20   ;;  %s1725_s19 = sphi %s1776_s19, %s2511_s19   ;;  %s1721_s18 = sphi %s1774_s18, %s2510_s18   ;;  %s1717_s17 = sphi %s1772_s17, %s2509_s17   ;;  %s1713_s16 = sphi %s1770_s16, %s2508_s16   ;;  %s1709_s15 = sphi %s1768_s15, %s2507_s15  }
   0x6   : > { %p28_p0 = scmp.ge.s32.totalorder %s27_s24, 2  ;;  %s30_s25 = sadd.s32 1, %s1733_s21 }
   0x7   : > { %s39_s26 = sadd.s32 1, %s1717_s17  ;;  %p46_p1 = scmp.ne.s32.totalorder %s1717_s17, %s1713_s16 }
   0x8   : > { %s2515_s24 = smov (%p28_p0, %s27_s24), 0  ;;  %s2517_s25 = smov (!%p28_p0, %s30_s25), %s1733_s21 }
   0x9   : > { %2502 = sst [smem:[#allocation5_spill]] %s2515_s24  ;;  %s35_s27 = ssub.s32 %s1729_s20, %s2515_s24 }
   0xa   : > { %p47_p2 = scmp.eq.s32.totalorder %s1737_s22, 0  ;;  %p32_p3 = scmp.ge.s32.totalorder %s2517_s25, 2 }
   0xb   : > { %p52_p4 = scmp.ne.s32.totalorder %s1713_s16, %s1709_s15  ;;  %p53_p6 = scmp.eq.s32.totalorder %s1483_s23, 0 }
   0xc   : > { %p1819_p5 = por %p47_p2, %p46_p1  ;;  %s2519_s25 = smov (%p32_p3, %s2517_s25), 0 }
   0xd   : > { %p1825_p7 = por %p53_p6, %p52_p4  ;;  %s34_s30 = ssub.s32 %s1733_s21, %s2519_s25 }
   0xe   : > { %p1507_p8 = scmp.lt.s32.totalorder %s1737_s22, 4  ;;  %s36_s5 = sor.u32 %s35_s27, %s34_s30 }
   0xf   : > { %s180_s6 = sand.u32 1, %s1717_s17   ;;  %p37_p9 = scmp.eq.s32.totalorder %s36_s5, 0 }
  0x10   : > { %s1487_s7 = sshll.u32 %s180_s6, 5  ;;  %s1488_s8 = sshll.u32 %s1729_s20, 2 }
  0x11   : > { %s1835_s9 = scalar_select %p37_p9, %s1717_s17, %s39_s26  }
  0x12   : > { %s1489_s10 = sshll.u32 %s1733_s21, 3  ;;  %s184_s12 = scalar_lea.vmem [#allocation2], %s1487_s7 }
  0x13   : > { %s190_s11 = sadd.s32 %s1489_s10, %s1488_s8  ;;  %s193_s13 = sshll.u32 %s184_s12, 4  ;;  %s194_s13 = int_to_ptr.vmem [resolvable:$true] %s193_s13 }
  0x14   : > { %s1490_s14 = sshll.u32 %s190_s11, 7  ;;  %p1845_p10 = pnand %p1507_p8, %p1819_p5 }
  0x15   : > { %s192_s24 = scalar_lea.hbm %s2496_s0, %s1490_s14  ;;  %p1491_p11 = scmp.ge.s32.totalorder %s1737_s22, 1 }
  0x16   : > { %s181_s26 = scalar_lea.sflag [#allocation3], %s180_s6  ;;  %p1645_p12 = pneg %p1845_p10 }
  0x17   : > { %s1656_s30 = scalar_lea.vmem %s194_s13, 512  ;;  %s1739_s5 = smov [#allocation2]  }
  0x18   : > { %p1657_p13 = scmp.ne.s32.totalorder %s194_s13, %s1656_s30  ;;  %s1661_s7 = sshll.u32 %s1739_s5, 4  ;;  %s1662_s7 = int_to_ptr.vmem [resolvable:$false] %s1661_s7 }
  0x19   : > { %s1663_s8 = scalar_lea.vmem %s1662_s7, 1024  ;;  %p1664_p2 = scmp.lt.s32.totalorder %s194_s13, %s1662_s7 }
  0x1a   : > { %p1659_p0 = pnand %p1657_p13, %p1645_p12  ;;  %p1665_p3 = scmp.lt.s32.totalorder %s1663_s8, %s1656_s30 }
  0x1c   : > { %p1660_p1 = pneg %p1659_p0  ;;  %p1666_p4 = por %p1665_p3, %p1664_p2 }
  0x1e   : > { %p1667_p5 = pnand %p1666_p4, %p1660_p1 }
  0x20   : > { %1670 = shalt.err (!%p1667_p5)
}
  0x21   : > { %s1740_s28 = smov 128   ;;  %s1741_s6 = smov 8  }
  0x22   : > { %1506 = dma.hbm_to_vmem [thread:$0]  (!%p1845_p10), %s192_s24, 512, %s194_s13, %s181_s26, %s1740_s28, %s1740_s28, %s1741_s6  }
  0x23   : > { %p201_p6 = scmp.lt.s32.totalorder %s1737_s22, 5 }
  0x25   : > { %p202_p8 = pnand %p1491_p11, %p201_p6 }
  0x26   : > { %s207_s10 = sand.u32 (!%p202_p8), 1, %s1713_s16  }
  0x27   : > { %205 = sbr.rel (%p202_p8) target bundleno = 381 (0x17d), region = 32  ;;  %s1492_s11 = sshll.u32 (!%p202_p8), %s207_s10, 5 }
  0x28   : > { %s208_s12 = scalar_lea.sflag (!%p202_p8), [#allocation3], %s207_s10  ;;  %s211_s14 = scalar_lea.vmem (!%p202_p8), [#allocation2], %s1492_s11 }
  0x2c   : > { %1704 = dma.done.wait (%p1825_p7), %s208_s12, 512  }
  0x2d   : > { %1706 = vsyncadd (%p1825_p7), %s208_s12, 4294966784  ;;  %v279_v0 = vlaneseq  ;;  %v1742_v1 = vmov 1966171168   ;;  %v1864_v6 = vld [vmem:[%s211_s14] sm:$0xff]  ;;  %v1866_v7 = vld [vmem:[%s211_s14 + $0x10] sm:$0xff]  ;;  %vm503_vm0 = vcmask 516096  }
  0x2e   : > { %v277_v2 = vunpack.c.l.s4 %v1742_v1  ;;  %v1868_v8 = vld [vmem:[%s211_s14 + $0x8] sm:$0xff]  ;;  %v270_v12 = vld [vmem:[%s211_s14 + $0x18] sm:$0xff]  ;;  %v275_v53 = vcombine.high %v1864_v6, %v1864_v6  ;;  %v373_v1 = vcombine.high %v1866_v7, %v1866_v7  ;;  %vm1054_vm1 = vcmask 1041409   ;;  %p249_p7 = scmp.lt.s32.totalorder %s1725_s19, 1  ;;  %p251_p9 = scmp.lt.s32.totalorder %s1721_s18, 1 }
  0x2f   : > { %v280_v3 = vshrl.u32 %v279_v0, 7  ;;  %v422_v39 = vcombine.high %v270_v12, %v270_v12  ;;  %v324_v60 = vcombine.high %v1868_v8, %v1868_v8  ;;  %vm1057_vm2 = vcmask 1042434  }
  0x30   : > { %v278_v4 = vunpack.c.0.s8 %v277_v2  ;;  %vm1060_vm3 = vcmask 1043459   ;;  %vm1063_vm4 = vcmask 1044484   ;;  %s2521_s19 = smov (!%p249_p7, %s1725_s19), 1  ;;  %vm1066_vm5 = vcmask 1045509   ;;  %s2523_s18 = smov (!%p251_p9, %s1721_s18), 1 }
  0x31   : > { %s1493_s24 = sshll.u32 %s2523_s18, 2  ;;  %s1494_s29 = sshll.u32 %s2521_s19, 3  ;;  %vm1069_vm6 = vcmask 1046534   ;;  %vm1072_vm7 = vcmask 1047559   ;;  %vm1124_vm8 = vcmask 7168  }
  0x32   : > { %v1862_v5 = vsub.s32 %v278_v4, %v280_v3  ;;  %s2332_s13 = sadd.s32 %s1494_s29, %s1493_s24 }
  0x33   : > { %s1495_s15 = sshll.u32 %s2332_s13, 3 }
  0x34   : > { %v282_v9 = vrot.slane %v1864_v6, %v1862_v5  ;;  %v380_v10 = vrot.slane %v1866_v7, %v1862_v5  ;;  %v331_v11 = vrot.slane %v1868_v8, %v1862_v5  ;;  %v429_v13 = vrot.slane %v270_v12, %v1862_v5  ;;  %s2354_s5 = scalar_lea.vmem %s2499_s3, %s1495_s15  ;;  %s2404_s12 = scalar_lea.vmem %s2500_s4, %s1495_s15 }
  0x35   : > { %v436_v43 = vrot.slane %v422_v39, %v1862_v5  ;;  %v289_v0 = vrot.slane %v275_v53, %v1862_v5  ;;  %v338_v6 = vrot.slane %v324_v60, %v1862_v5 }
  0x36   : > { %v1878_v14 = vrot.slane %v282_v9, %v1862_v5  ;;  %v290_v15 = vcombine.high %v282_v9, %v282_v9  ;;  %v388_v16 = vcombine.high %v380_v10, %v380_v10  ;;  %v339_v17 = vcombine.high %v331_v11, %v331_v11 }
  0x37   : > { %v1881_v18 = vrot.slane %v331_v11, %v1862_v5  ;;  %v437_v26 = vcombine.high %v429_v13, %v429_v13  ;;  %v1901_v29 = vrot.slane %v429_v13, %v1862_v5  ;;  %v1906_v32 = vrot.slane %v380_v10, %v1862_v5 }
  0x38   : > { %v504_v19 = vsel %vm503_vm0, %v1878_v14, 0.0  ;;  %v1887_v20 = vcombine.high %v1878_v14, %v1878_v14  ;;  %v312_v21 = vrot.slane %v290_v15, %v1862_v5  ;;  %v410_v22 = vrot.slane %v388_v16, %v1862_v5 }
  0x39   : > { %505 = vadd.xlane.f32.xlu0 %v504_v19  ;;  %v361_v25 = vrot.slane %v339_v17, %v1862_v5  ;;  %v1898_v28 = vcombine.high %v1881_v18, %v1881_v18  ;;  %v459_v31 = vrot.slane %v437_v26, %v1862_v5  ;;  %v1912_v34 = vcombine.high %v1901_v29, %v1901_v29 }
  0x3a   : > { %v510_v23 = vsel %vm503_vm0, %v1887_v20, 0.0  ;;  %v507_v24 = vsel %vm503_vm0, %v312_v21, 0.0  ;;  %v555_v27 = vsel %vm503_vm0, %v410_v22, 0.0  ;;  %v1917_v36 = vcombine.high %v1906_v32, %v1906_v32 }
  0x3b   : > { %511 = vadd.xlane.f32.xlu1 %v510_v23  ;;  %v531_v30 = vsel %vm503_vm0, %v361_v25, 0.0  ;;  %v534_v33 = vsel %vm503_vm0, %v1898_v28, 0.0  ;;  %v579_v35 = vsel %vm503_vm0, %v459_v31, 0.0  ;;  %v582_v37 = vsel %vm503_vm0, %v1912_v34, 0.0 }
  0x3c   : > { %v1921_v38 = vcombine.high %v312_v21, %v312_v21  ;;  %v558_v40 = vsel %vm503_vm0, %v1917_v36, 0.0  ;;  %v1927_v42 = vcombine.high %v361_v25, %v361_v25  ;;  %v528_v44 = vsel %vm503_vm0, %v1881_v18, 0.0 }
  0x3d   : > { %508 = vadd.xlane.f32.xlu0 %v507_v24  ;;  %v438_v45 = vcombine.high %v436_v43, %v436_v43  ;;  %v1934_v47 = vcombine.high %v410_v22, %v410_v22  ;;  %v552_v48 = vsel %vm503_vm0, %v1906_v32, 0.0  ;;  %v1943_v51 = vcombine.high %v459_v31, %v459_v31 }
  0x3e   : > { %v513_v41 = vsel %vm503_vm0, %v1921_v38, 0.0  ;;  %v537_v46 = vsel %vm503_vm0, %v1927_v42, 0.0  ;;  %v576_v54 = vsel %vm503_vm0, %v1901_v29, 0.0  ;;  %v634_v55 = vmul.f32 %v312_v21, %v312_v21 }
  0x3f   : > { %556 = vadd.xlane.f32.xlu1 %v555_v27  ;;  %v1939_v49 = vrot.slane %v438_v45, %v1862_v5  ;;  %v561_v50 = vsel %vm503_vm0, %v1934_v47, 0.0  ;;  %v585_v58 = vsel %vm503_vm0, %v1943_v51, 0.0  ;;  %v642_v59 = vmul.f32 %v361_v25, %v361_v25 }
  0x40   : > { %v668_v62 = vsel %vm503_vm0, %v634_v55, 0.0  ;;  %v650_v63 = vmul.f32 %v410_v22, %v410_v22  ;;  %v658_v4 = vmul.f32 %v459_v31, %v459_v31  ;;  %v1974_v10 = vrot.slane %v289_v0, %v1862_v5 }
  0x41   : > { %532 = vadd.xlane.f32.xlu0 %v531_v30  ;;  %v470_v52 = vcombine.high %v1939_v49, %v1939_v49  ;;  %v662_v57 = vmul.f32 %v1939_v49, %v1939_v49  ;;  %v692_v3 = vsel %vm503_vm0, %v642_v59, 0.0  ;;  %v387_v11 = vrot.slane %v373_v1, %v1862_v5 }
  0x42   : > { %v716_v9 = vsel %vm503_vm0, %v650_v63, 0.0  ;;  %v740_v7 = vsel %vm503_vm0, %v658_v4, 0.0  ;;  %v1979_v12 = vrot.slane %v338_v6, %v1862_v5  ;;  %v516_v13 = vsel %vm503_vm0, %v1974_v10, 0.0 }
  0x43   : > { %535 = vadd.xlane.f32.xlu1 %v534_v33  ;;  %v1952_v56 = vsel %vm503_vm0, %v470_v52, 0.0  ;;  %v1961_v61 = vsel %vm503_vm0, %v662_v57, 0.0  ;;  %v664_v2 = vmul.f32 %v470_v52, %v470_v52  ;;  %v1984_v15 = vrot.slane %v387_v11, %v1862_v5 }
  0x44   : > { %v540_v16 = vsel %vm503_vm0, %v1979_v12, 0.0  ;;  %v1989_v17 = vrot.slane %v436_v43, %v1862_v5  ;;  %v635_v21 = vmul.f32 %v1887_v20, %v1887_v20  ;;  %v643_v23 = vmul.f32 %v1898_v28, %v1898_v28 }
  0x45   : > { %580 = vadd.xlane.f32.xlu0 %v579_v35  ;;  %v1970_v8 = vsel %vm503_vm0, %v664_v2, 0.0  ;;  %v564_v19 = vsel %vm503_vm0, %v1984_v15, 0.0  ;;  %v651_v25 = vmul.f32 %v1917_v36, %v1917_v36  ;;  %v291_v26 = vcombine.high %v289_v0, %v289_v0 }
  0x46   : > { %v588_v22 = vsel %vm503_vm0, %v1989_v17, 0.0  ;;  %v671_v24 = vsel %vm503_vm0, %v635_v21, 0.0  ;;  %v695_v27 = vsel %vm503_vm0, %v643_v23, 0.0  ;;  %v659_v20 = vmul.f32 %v1912_v34, %v1912_v34 }
  0x47   : > { %583 = vadd.xlane.f32.xlu1 %v582_v37  ;;  %v340_v30 = vcombine.high %v338_v6, %v338_v6  ;;  %v719_v31 = vsel %vm503_vm0, %v651_v25, 0.0  ;;  %v2007_v33 = vrot.slane %v291_v26, %v1862_v5  ;;  %v389_v28 = vcombine.high %v387_v11, %v387_v11 }
  0x48   : > { %v743_v35 = vsel %vm503_vm0, %v659_v20, 0.0  ;;  %v591_v43 = vsel %vm503_vm0, %v1939_v49, 0.0  ;;  %v641_v45 = vmul.f32 %v1881_v18, %v1881_v18  ;;  %v649_v49 = vmul.f32 %v1906_v32, %v1906_v32 }
  0x49   : > { %559 = vadd.xlane.f32.xlu0 %v558_v40  ;;  %v2011_v36 = vrot.slane %v340_v30, %v1862_v5  ;;  %v519_v37 = vsel %vm503_vm0, %v2007_v33, 0.0  ;;  %v2016_v34 = vrot.slane %v389_v28, %v1862_v5  ;;  %v657_v52 = vmul.f32 %v1901_v29, %v1901_v29 }
  0x4a   : > { %v713_v18 = vsel %vm503_vm0, %v649_v49, 0.0  ;;  %v660_v53 = vmul.f32 %v1943_v51, %v1943_v51  ;;  %v370_v55 = vcombine.high %v1979_v12, %v1979_v12  ;;  %v419_v57 = vcombine.high %v1984_v15, %v1984_v15 }
  0x4b   : > { %514 = vadd.xlane.f32.xlu1 %v513_v41  ;;  %v543_v39 = vsel %vm503_vm0, %v2011_v36, 0.0  ;;  %v567_v40 = vsel %vm503_vm0, %v2016_v34, 0.0  ;;  %v633_v41 = vmul.f32 %v1878_v14, %v1878_v14  ;;  %v689_v14 = vsel %vm503_vm0, %v641_v45, 0.0 }
  0x4c   : > { %v737_v32 = vsel %vm503_vm0, %v657_v52, 0.0  ;;  %v546_v51 = vsel %vm503_vm0, %v370_v55, 0.0  ;;  %v570_v59 = vsel %vm503_vm0, %v419_v57, 0.0  ;;  %v637_v60 = vmul.f32 %v1974_v10, %v1974_v10 }
  0x4d   : > { %529 = vadd.xlane.f32.xlu0 %v528_v44  ;;  %v636_v44 = vmul.f32 %v1921_v38, %v1921_v38  ;;  %v665_v5 = vsel %vm503_vm0, %v633_v41, 0.0  ;;  %v645_v63 = vmul.f32 %v1979_v12, %v1979_v12  ;;  %v653_v1 = vmul.f32 %v1984_v15, %v1984_v15 }
  0x4e   : > { %v677_v0 = vsel %vm503_vm0, %v637_v60, 0.0  ;;  %v323_v6 = vcombine.high %v2007_v33, %v2007_v33  ;;  %v638_v15 = vmul.f32 %v2007_v33, %v2007_v33  ;;  %v655_v26 = vmul.f32 %v419_v57, %v419_v57 }
  0x4f   : > { %538 = vadd.xlane.f32.xlu1 %v537_v46  ;;  %v674_v46 = vsel %vm503_vm0, %v636_v44, 0.0  ;;  %v701_v2 = vsel %vm503_vm0, %v645_v63, 0.0  ;;  %v725_v4 = vsel %vm503_vm0, %v653_v1, 0.0 }
  0x50   : > { %v525_v11 = vsel %vm503_vm0, %v323_v6, 0.0  ;;  %v640_v30 = vmul.f32 %v323_v6, %v323_v6 }
  0x51   : > { %553 = vadd.xlane.f32.xlu0 %v552_v48  ;;  %v644_v48 = vmul.f32 %v1927_v42, %v1927_v42 }
  0x52   : > { %v686_v28 = vsel %vm503_vm0, %v640_v30, 0.0 }
  0x53   : > { %562 = vadd.xlane.f32.xlu1 %v561_v50  ;;  %v698_v38 = vsel %vm503_vm0, %v644_v48, 0.0  ;;  %v652_v50 = vmul.f32 %v1934_v47, %v1934_v47  ;;  %v746_v47 = vsel %vm503_vm0, %v660_v53, 0.0 }
  0x55   : > { %577 = vadd.xlane.f32.xlu0 %v576_v54  ;;  %v722_v42 = vsel %vm503_vm0, %v652_v50, 0.0  ;;  %v321_v54 = vcombine.high %v1974_v10, %v1974_v10  ;;  %v372_v10 = vcombine.high %v2011_v36, %v2011_v36 }
  0x57   : > { %586 = vadd.xlane.f32.xlu1 %v585_v58  ;;  %v522_v29 = vsel %vm503_vm0, %v321_v54, 0.0  ;;  %v468_v58 = vcombine.high %v1989_v17, %v1989_v17  ;;  %v549_v12 = vsel %vm503_vm0, %v372_v10, 0.0  ;;  %v639_v23 = vmul.f32 %v321_v54, %v321_v54 }
  0x58   : > { %v648_v33 = vmul.f32 %v372_v10, %v372_v10 }
  0x59   : > { %669 = vadd.xlane.f32.xlu0 %v668_v62  ;;  %v594_v62 = vsel %vm503_vm0, %v468_v58, 0.0  ;;  %v683_v25 = vsel %vm503_vm0, %v639_v23, 0.0  ;;  %v663_v20 = vmul.f32 %v468_v58, %v468_v58 }
  0x5b   : > { %693 = vadd.xlane.f32.xlu1 %v692_v3  ;;  %v661_v3 = vmul.f32 %v1989_v17, %v1989_v17  ;;  %v680_v17 = vsel %vm503_vm0, %v638_v15, 0.0 }
  0x5d   : > { %717 = vadd.xlane.f32.xlu0 %v716_v9  ;;  %v749_v9 = vsel %vm503_vm0, %v661_v3, 0.0 }
  0x5f   : > { %741 = vadd.xlane.f32.xlu1 %v740_v7  ;;  %v421_v7 = vcombine.high %v2016_v34, %v2016_v34 }
  0x61   : > { %517 = vadd.xlane.f32.xlu0 %v516_v13  ;;  %v573_v13 = vsel %vm503_vm0, %v421_v7, 0.0 }
  0x63   : > { %541 = vadd.xlane.f32.xlu1 %v540_v16  ;;  %v646_v16 = vmul.f32 %v2011_v36, %v2011_v36  ;;  %v710_v36 = vsel %vm503_vm0, %v648_v33, 0.0 }
  0x65   : > { %565 = vadd.xlane.f32.xlu0 %v564_v19  ;;  %v654_v19 = vmul.f32 %v2016_v34, %v2016_v34  ;;  %v704_v21 = vsel %vm503_vm0, %v646_v16, 0.0 }
  0x67   : > { %589 = vadd.xlane.f32.xlu1 %v588_v22  ;;  %v728_v22 = vsel %vm503_vm0, %v654_v19, 0.0 }
  0x69   : > { %672 = vadd.xlane.f32.xlu0 %v671_v24  ;;  %v647_v24 = vmul.f32 %v370_v55, %v370_v55 }
  0x6b   : > { %696 = vadd.xlane.f32.xlu1 %v695_v27  ;;  %v707_v27 = vsel %vm503_vm0, %v647_v24, 0.0 }
  0x6d   : > { %720 = vadd.xlane.f32.xlu0 %v719_v31  ;;  %v755_v31 = vsel %vm503_vm0, %v663_v20, 0.0 }
  0x6f   : > { %744 = vadd.xlane.f32.xlu1 %v743_v35  ;;  %v656_v35 = vmul.f32 %v421_v7, %v421_v7 }
  0x71   : > { %520 = vadd.xlane.f32.xlu0 %v519_v37 }
  0x73   : > { %544 = vadd.xlane.f32.xlu1 %v543_v39 }
  0x75   : > { %568 = vadd.xlane.f32.xlu0 %v567_v40 }
  0x77   : > { %592 = vadd.xlane.f32.xlu1 %v591_v43 }
  0x79   : > { %666 = vadd.xlane.f32.xlu0 %v665_v5 }
  0x7b   : > { %675 = vadd.xlane.f32.xlu1 %v674_v46 }
  0x7d   : > { %690 = vadd.xlane.f32.xlu0 %v689_v14 }
  0x7f   : > { %699 = vadd.xlane.f32.xlu1 %v698_v38 }
  0x81   : > { %714 = vadd.xlane.f32.xlu0 %v713_v18 }
  0x83   : > { %723 = vadd.xlane.f32.xlu1 %v722_v42 }
  0x85   : > { %738 = vadd.xlane.f32.xlu0 %v737_v32 }
  0x87   : > { %747 = vadd.xlane.f32.xlu1 %v746_v47 }
  0x89   : > { %523 = vadd.xlane.f32.xlu0 %v522_v29 }
  0x8b   : > { %547 = vadd.xlane.f32.xlu1 %v546_v51 }
  0x8d   : > { %571 = vadd.xlane.f32.xlu0 %v570_v59 }
  0x8f   : > { %595 = vadd.xlane.f32.xlu1 %v594_v62 }
  0x91   : > { %678 = vadd.xlane.f32.xlu0 %v677_v0 }
  0x93   : > { %702 = vadd.xlane.f32.xlu1 %v701_v2 }
  0x95   : > { %726 = vadd.xlane.f32.xlu0 %v725_v4 }
  0x97   : > { %750 = vadd.xlane.f32.xlu1 %v749_v9 }
  0x99   : > { %526 = vadd.xlane.f32.xlu0 %v525_v11 }
  0x9b   : > { %550 = vadd.xlane.f32.xlu1 %v549_v12 }
  0x9d   : > { %574 = vadd.xlane.f32.xlu0 %v573_v13 }
  0x9f   : > { %598 = vadd.xlane.f32.xlu1 %v1952_v56  ;;  %v731_v56 = vsel %vm503_vm0, %v655_v26, 0.0 }
  0xa1   : > { %681 = vadd.xlane.f32.xlu0 %v680_v17 }
  0xa3   : > { %705 = vadd.xlane.f32.xlu1 %v704_v21 }
  0xa5   : > { %729 = vadd.xlane.f32.xlu0 %v728_v22 }
  0xa7   : > { %753 = vadd.xlane.f32.xlu1 %v1961_v61  ;;  %v734_v61 = vsel %vm503_vm0, %v656_v35, 0.0 }
  0xa9   : > { %684 = vadd.xlane.f32.xlu0 %v683_v25 }
  0xab   : > { %708 = vadd.xlane.f32.xlu1 %v707_v27 }
  0xad   : > { %732 = vadd.xlane.f32.xlu0 %v731_v56 }
  0xaf   : > { %756 = vadd.xlane.f32.xlu1 %v755_v31 }
  0xb1   : > { %687 = vadd.xlane.f32.xlu0 %v686_v28 }
  0xb3   : > { %711 = vadd.xlane.f32.xlu1 %v710_v36 }
  0xb5   : > { %735 = vadd.xlane.f32.xlu0 %v734_v61 }
  0xb7   : > { %759 = vadd.xlane.f32.xlu1 %v1970_v8 }
  0xc2   : > { %v506_v37 = vpop.xlane.xlu0 %505 }
  0xc3   : > { %v2156_v61 = vmul.f32 0.015625, %v506_v37 }
  0xc4   : > { %v512_v34 = vpop.xlane.xlu1 %511 }
  0xc5   : > { %v2132_v10 = vmul.f32 0.015625, %v512_v34  ;;  %v857_v37 = vmul.f32 %v2156_v61, %v2156_v61 }
  0xc6   : > { %v509_v39 = vpop.xlane.xlu0 %508 }
  0xc7   : > { %v2102_v18 = vmul.f32 0.015625, %v509_v39  ;;  %v859_v13 = vmul.f32 %v2132_v10, %v2132_v10 }
  0xc8   : > { %v557_v40 = vpop.xlane.xlu1 %556 }
  0xc9   : > { %v858_v53 = vmul.f32 %v2102_v18, %v2102_v18  ;;  %v2110_v32 = vmul.f32 0.015625, %v557_v40 }
  0xca   : > { %v533_v41 = vpop.xlane.xlu0 %532 }
  0xcb   : > { %v2106_v8 = vmul.f32 0.015625, %v533_v41  ;;  %v874_v59 = vmul.f32 %v2110_v32, %v2110_v32 }
  0xcc   : > { %v536_v43 = vpop.xlane.xlu1 %535 }
  0xcd   : > { %v866_v55 = vmul.f32 %v2106_v8, %v2106_v8  ;;  %v2136_v7 = vmul.f32 0.015625, %v536_v43 }
  0xce   : > { %v581_v44 = vpop.xlane.xlu0 %580 }
  0xcf   : > { %v2114_v29 = vmul.f32 0.015625, %v581_v44  ;;  %v867_v19 = vmul.f32 %v2136_v7, %v2136_v7 }
  0xd0   : > { %v584_v5 = vpop.xlane.xlu1 %583 }
  0xd1   : > { %v2120_v0 = vmul.f32 %v2114_v29, %v2114_v29  ;;  %v2144_v23 = vmul.f32 0.015625, %v584_v5 }
  0xd2   : > { %v560_v45 = vpop.xlane.xlu0 %559 }
  0xd3   : > { %v2140_v15 = vmul.f32 0.015625, %v560_v45  ;;  %v883_v30 = vmul.f32 %v2144_v23, %v2144_v23 }
  0xd4   : > { %v515_v46 = vpop.xlane.xlu1 %514 }
  0xd5   : > { %v875_v25 = vmul.f32 %v2140_v15, %v2140_v15  ;;  %v2158_v39 = vmul.f32 0.015625, %v515_v46 }
  0xd6   : > { %v530_v48 = vpop.xlane.xlu0 %529 }
  0xd7   : > { %v2162_v43 = vmul.f32 0.015625, %v530_v48  ;;  %v860_v46 = vmul.f32 %v2158_v39, %v2158_v39 }
  0xd8   : > { %v539_v14 = vpop.xlane.xlu1 %538 }
  0xd9   : > { %v2164_v44 = vmul.f32 0.015625, %v539_v14  ;;  %v865_v14 = vmul.f32 %v2162_v43, %v2162_v43 }
  0xda   : > { %v554_v49 = vpop.xlane.xlu0 %553 }
  0xdb   : > { %v2166_v5 = vmul.f32 0.015625, %v554_v49  ;;  %v868_v49 = vmul.f32 %v2164_v44, %v2164_v44 }
  0xdc   : > { %v563_v38 = vpop.xlane.xlu1 %562 }
  0xdd   : > { %v2168_v45 = vmul.f32 0.015625, %v563_v38 }
  0xde   : > { %v2100_v50 = vpop.xlane.xlu0 %577 }
  0xe0   : > { %v2104_v52 = vpop.xlane.xlu1 %586 }
  0xe2   : > { %v670_v42 = vpop.xlane.xlu0 %669 }
  0xe3   : > { %v762_v54 = vmul.f32 0.015625, %v670_v42 }
  0xe4   : > { %v694_v47 = vpop.xlane.xlu1 %693 }
  0xe5   : > { %v890_v57 = vsub.f32 %v762_v54, %v858_v53  ;;  %v770_v51 = vmul.f32 0.015625, %v694_v47 }
  0xe6   : > { %v718_v58 = vpop.xlane.xlu0 %717 }
  0xe7   : > { %v898_v60 = vsub.f32 %v770_v51, %v866_v55  ;;  %v778_v62 = vmul.f32 0.015625, %v718_v58  ;;  %v922_v34 = vmax.f32 %v890_v57, 0.0  ;;  %v873_v58 = vmul.f32 %v2166_v5, %v2166_v5 }
  0xe8   : > { %v742_v63 = vpop.xlane.xlu1 %741 }
  0xe9   : > { %v906_v1 = vsub.f32 %v778_v62, %v874_v59  ;;  %v2122_v2 = vmul.f32 0.015625, %v742_v63  ;;  %v930_v42 = vmax.f32 %v898_v60, 0.0  ;;  %v954_v54 = vadd.f32 1e-06, %v922_v34 }
  0xea   : > { %v2124_v3 = vpop.xlane.xlu0 %517  ;;  %v876_v59 = vmul.f32 %v2168_v45, %v2168_v45 }
  0xeb   : > { %v914_v4 = vsub.f32 %v2122_v2, %v2120_v0  ;;  %v962_v60 = vadd.f32 1e-06, %v930_v42  ;;  %v938_v62 = vmax.f32 %v906_v1, 0.0  ;;  %1579 = vrsqrt.f32 %v954_v54 }
  0xec   : > { %v2128_v6 = vpop.xlane.xlu1 %541 }
  0xed   : > { %v970_v1 = vadd.f32 1e-06, %v938_v62 }
  0xee   : > { %v2130_v9 = vpop.xlane.xlu0 %565 }
  0xf0   : > { %v2134_v11 = vpop.xlane.xlu1 %589 }
  0xf2   : > { %v673_v12 = vpop.xlane.xlu0 %672 }
  0xf3   : > { %v763_v16 = vmul.f32 0.015625, %v673_v12 }
  0xf4   : > { %v697_v17 = vpop.xlane.xlu1 %696 }
  0xf5   : > { %v891_v21 = vsub.f32 %v763_v16, %v859_v13  ;;  %v771_v22 = vmul.f32 0.015625, %v697_v17  ;;  %v2183_v13 = vmul.f32 0.015625, %v2100_v50 }
  0xf6   : > { %v721_v24 = vpop.xlane.xlu0 %720 }
  0xf7   : > { %v899_v26 = vsub.f32 %v771_v22, %v867_v19  ;;  %v779_v27 = vmul.f32 0.015625, %v721_v24  ;;  %v923_v40 = vmax.f32 %v891_v21, 0.0  ;;  %v946_v21 = vmax.f32 %v914_v4, 0.0 }
  0xf8   : > { %v745_v20 = vpop.xlane.xlu1 %744 }
  0xf9   : > { %v907_v56 = vsub.f32 %v779_v27, %v875_v25  ;;  %v787_v31 = vmul.f32 0.015625, %v745_v20  ;;  %v955_v55 = vadd.f32 1e-06, %v923_v40  ;;  %v931_v57 = vmax.f32 %v899_v26, 0.0 }
  0xfa   : > { %v2150_v33 = vpop.xlane.xlu0 %520  ;;  %v2186_v26 = vmul.f32 0.015625, %v2104_v52  ;;  %v978_v4 = vadd.f32 1e-06, %v946_v21  ;;  %v881_v52 = vmul.f32 %v2183_v13, %v2183_v13 }
  0xfb   : > { %v915_v28 = vsub.f32 %v787_v31, %v883_v30  ;;  %1581 = vrsqrt.f32 %v955_v55  ;;  %v963_v16 = vadd.f32 1e-06, %v931_v57  ;;  %v939_v17 = vmax.f32 %v907_v56, 0.0 }
  0xfc   : > { %v2152_v35 = vpop.xlane.xlu1 %544  ;;  %1583 = vrsqrt.f32 %v962_v60 }
  0xfd   : > { %v947_v30 = vmax.f32 %v915_v28, 0.0  ;;  %v971_v34 = vadd.f32 1e-06, %v939_v17 }
  0xfe   : > { %v2154_v36 = vpop.xlane.xlu0 %568 }
  0xff   : > { %v979_v28 = vadd.f32 1e-06, %v947_v30  ;;  %v2202_v30 = vmul.f32 0.015625, %v2128_v6  ;;  %v2211_v6 = vmul.f32 0.015625, %v2130_v9  ;;  %v2220_v9 = vmul.f32 0.015625, %v2134_v11 }
 0x100   : > { %v2160_v41 = vpop.xlane.xlu1 %592 }
 0x102   : > { %v667_v53 = vpop.xlane.xlu0 %666 }
 0x103   : > { %v761_v47 = vmul.f32 0.015625, %v667_v53 }
 0x104   : > { %v676_v48 = vpop.xlane.xlu1 %675 }
 0x105   : > { %v889_v38 = vsub.f32 %v761_v47, %v857_v37  ;;  %v764_v51 = vmul.f32 0.015625, %v676_v48  ;;  %v884_v48 = vmul.f32 %v2186_v26, %v2186_v26 }
 0x106   : > { %v691_v63 = vpop.xlane.xlu0 %690 }
 0x107   : > { %v921_v0 = vmax.f32 %v889_v38, 0.0  ;;  %v892_v2 = vsub.f32 %v764_v51, %v860_v46  ;;  %v769_v12 = vmul.f32 0.015625, %v691_v63 }
 0x108   : > { %v700_v19 = vpop.xlane.xlu1 %699 }
 0x109   : > { %v953_v22 = vadd.f32 1e-06, %v921_v0  ;;  %v924_v24 = vmax.f32 %v892_v2, 0.0  ;;  %v897_v25 = vsub.f32 %v769_v12, %v865_v14  ;;  %v772_v27 = vmul.f32 0.015625, %v700_v19  ;;  %v1580_v12 = vpop.eup %1579 }
 0x10a   : > { %v715_v20 = vpop.xlane.xlu0 %714  ;;  %v1582_v17 = vpop.eup %1581 }
 0x10b   : > { %1585 = vrsqrt.f32 %v953_v22  ;;  %v956_v31 = vadd.f32 1e-06, %v924_v24  ;;  %v929_v50 = vmax.f32 %v897_v25, 0.0  ;;  %v900_v40 = vsub.f32 %v772_v27, %v868_v49  ;;  %v1584_v25 = vpop.eup %1583 }
 0x10c   : > { %1587 = vrsqrt.f32 %v963_v16  ;;  %v777_v56 = vmul.f32 0.015625, %v715_v20  ;;  %v724_v42 = vpop.xlane.xlu1 %723  ;;  %v2197_v22 = vmul.f32 0.015625, %v2124_v3 }
 0x10d   : > { %1589 = vrsqrt.f32 %v956_v31  ;;  %v961_v53 = vadd.f32 1e-06, %v929_v50  ;;  %v780_v37 = vmul.f32 0.015625, %v724_v42  ;;  %v932_v54 = vmax.f32 %v900_v40, 0.0 }
 0x10e   : > { %1591 = vrsqrt.f32 %v970_v1  ;;  %v905_v47 = vsub.f32 %v777_v56, %v873_v58  ;;  %v739_v46 = vpop.xlane.xlu0 %738  ;;  %v1053_v1 = vrot.slane %v1580_v12, 7  ;;  %v1056_v31 = vrot.slane %v1582_v17, 6 }
 0x10f   : > { %1593 = vrsqrt.f32 %v961_v53  ;;  %v908_v55 = vsub.f32 %v780_v37, %v876_v59  ;;  %v785_v57 = vmul.f32 0.015625, %v739_v46  ;;  %v964_v14 = vadd.f32 1e-06, %v932_v54 }
 0x110   : > { %1595 = vrsqrt.f32 %v971_v34  ;;  %v937_v49 = vmax.f32 %v905_v47, 0.0  ;;  %v748_v38 = vpop.xlane.xlu1 %747  ;;  %v861_v56 = vmul.f32 %v2197_v22, %v2197_v22  ;;  %v1074_v37 = vrot.slane %v1584_v25, 7 }
 0x111   : > { %1597 = vrsqrt.f32 %v978_v4  ;;  %v940_v51 = vmax.f32 %v908_v55, 0.0  ;;  %v913_v60 = vsub.f32 %v785_v57, %v881_v52  ;;  %v788_v62 = vmul.f32 0.015625, %v748_v38 }
 0x112   : > { %1599 = vrsqrt.f32 %v964_v14  ;;  %v969_v63 = vadd.f32 1e-06, %v937_v49  ;;  %v2192_v0 = vpop.xlane.xlu0 %523  ;;  %v869_v46 = vmul.f32 %v2202_v30, %v2202_v30 }
 0x113   : > { %1601 = vrsqrt.f32 %v979_v28  ;;  %v972_v58 = vadd.f32 1e-06, %v940_v51  ;;  %v945_v2 = vmax.f32 %v913_v60, 0.0  ;;  %v916_v59 = vsub.f32 %v788_v62, %v884_v48 }
 0x114   : > { %1603 = vrsqrt.f32 %v969_v63  ;;  %v2194_v16 = vpop.xlane.xlu1 %547 }
 0x115   : > { %1605 = vrsqrt.f32 %v972_v58  ;;  %v977_v19 = vadd.f32 1e-06, %v945_v2  ;;  %v948_v21 = vmax.f32 %v916_v59, 0.0  ;;  %v877_v58 = vmul.f32 %v2211_v6, %v2211_v6 }
 0x116   : > { %v2199_v24 = vpop.xlane.xlu0 %571 }
 0x117   : > { %1607 = vrsqrt.f32 %v977_v19  ;;  %v980_v27 = vadd.f32 1e-06, %v948_v21 }
 0x118   : > { %v1586_v20 = vpop.eup %1585  ;;  %v2204_v50 = vpop.xlane.xlu1 %595 }
 0x119   : > { %v1588_v34 = vpop.eup %1587  ;;  %v1055_v40 = vsel %vm1054_vm1, %v1053_v1, %v1586_v20  ;;  %1609 = vrsqrt.f32 %v980_v27 }
 0x11a   : > { %v1590_v3 = vpop.eup %1589  ;;  %v1058_v42 = vsel %vm1057_vm2, %v1056_v31, %v1055_v40  ;;  %v679_v4 = vpop.xlane.xlu0 %678  ;;  %v1076_v28 = vrot.slane %v1588_v34, 6 }
 0x11b   : > { %v1592_v53 = vpop.eup %1591  ;;  %v1059_v52 = vrot.slane %v1590_v3, 5  ;;  %v765_v54 = vmul.f32 0.015625, %v679_v4 }
 0x11c   : > { %v1594_v47 = vpop.eup %1593  ;;  %v703_v55 = vpop.xlane.xlu1 %702  ;;  %v1088_v19 = vrot.slane %v1592_v53, 7 }
 0x11d   : > { %v1596_v57 = vpop.eup %1595  ;;  %v2216_v48 = vsel %vm1060_vm3, %v1059_v52, %v1058_v42  ;;  %v1075_v14 = vsel %vm1054_vm1, %v1074_v37, %v1594_v47  ;;  %v893_v49 = vsub.f32 %v765_v54, %v861_v56  ;;  %v773_v38 = vmul.f32 0.015625, %v703_v55 }
 0x11e   : > { %v1598_v51 = vpop.eup %1597  ;;  %v1077_v60 = vsel %vm1057_vm2, %v1076_v28, %v1075_v14  ;;  %v727_v62 = vpop.xlane.xlu0 %726  ;;  %v1090_v21 = vrot.slane %v1596_v57, 6  ;;  %v885_v56 = vmul.f32 %v2220_v9, %v2220_v9 }
 0x11f   : > { %v1600_v63 = vpop.eup %1599  ;;  %v925_v2 = vmax.f32 %v893_v49, 0.0  ;;  %v901_v59 = vsub.f32 %v773_v38, %v869_v46  ;;  %v781_v12 = vmul.f32 0.015625, %v727_v62  ;;  %v1102_v3 = vrot.slane %v1598_v51, 7 }
 0x120   : > { %v1602_v17 = vpop.eup %1601  ;;  %v1078_v25 = vrot.slane %v1600_v63, 5  ;;  %v751_v1 = vpop.xlane.xlu1 %750 }
 0x121   : > { %v1604_v27 = vpop.eup %1603  ;;  %v957_v20 = vadd.f32 1e-06, %v925_v2  ;;  %v933_v31 = vmax.f32 %v901_v59, 0.0  ;;  %v909_v11 = vsub.f32 %v781_v12, %v877_v58  ;;  %v789_v34 = vmul.f32 0.015625, %v751_v1 }
 0x122   : > { %v1606_v40 = vpop.eup %1605  ;;  %v2228_v42 = vsel %vm1060_vm3, %v1078_v25, %v1077_v60  ;;  %v1089_v4 = vsel %vm1054_vm1, %v1088_v19, %v1604_v27  ;;  %v2231_v37 = vpop.xlane.xlu0 %526  ;;  %v1104_v46 = vrot.slane %v1602_v17, 6  ;;  %v2249_v17 = vmul.f32 0.015625, %v2150_v33 }
 0x123   : > { %v1091_v53 = vsel %vm1057_vm2, %v1090_v21, %v1089_v4  ;;  %v1092_v52 = vrot.slane %v1606_v40, 5  ;;  %1611 = vrsqrt.f32 %v957_v20  ;;  %v965_v54 = vadd.f32 1e-06, %v933_v31 }
 0x124   : > { %v1608_v47 = vpop.eup %1607  ;;  %v941_v28 = vmax.f32 %v909_v11, 0.0  ;;  %v917_v55 = vsub.f32 %v789_v34, %v885_v56  ;;  %v2234_v57 = vpop.xlane.xlu1 %550  ;;  %v2252_v19 = vmul.f32 0.015625, %v2152_v35  ;;  %v2255_v25 = vmul.f32 0.015625, %v2154_v36 }
 0x125   : > { %v2237_v14 = vsel %vm1060_vm3, %v1092_v52, %v1091_v53  ;;  %v1103_v49 = vsel %vm1054_vm1, %v1102_v3, %v1608_v47  ;;  %1613 = vrsqrt.f32 %v965_v54  ;;  %v862_v31 = vmul.f32 %v2249_v17, %v2249_v17 }
 0x126   : > { %v1610_v38 = vpop.eup %1609  ;;  %v1105_v51 = vsel %vm1057_vm2, %v1104_v46, %v1103_v49  ;;  %v973_v60 = vadd.f32 1e-06, %v941_v28  ;;  %v949_v62 = vmax.f32 %v917_v55, 0.0  ;;  %v2241_v63 = vpop.xlane.xlu0 %574  ;;  %v870_v11 = vmul.f32 %v2252_v19, %v2252_v19 }
 0x127   : > { %v1106_v58 = vrot.slane %v1610_v38, 5  ;;  %v2262_v33 = vmul.f32 0.015625, %v2160_v41  ;;  %v2265_v35 = vmul.f32 0.015625, %v2192_v0  ;;  %v878_v36 = vmul.f32 %v2255_v25, %v2255_v25 }
 0x128   : > { %1615 = vrsqrt.f32 %v973_v60  ;;  %v981_v2 = vadd.f32 1e-06, %v949_v62  ;;  %v2243_v59 = vpop.xlane.xlu1 %598  ;;  %v2270_v40 = vmul.f32 0.015625, %v2194_v16  ;;  %v2273_v3 = vmul.f32 0.015625, %v2199_v24 }
 0x129   : > { %v2246_v12 = vsel %vm1060_vm3, %v1106_v58, %v1105_v51  ;;  %v886_v46 = vmul.f32 %v2262_v33, %v2262_v33  ;;  %v863_v28 = vmul.f32 %v2265_v35, %v2265_v35  ;;  %v2288_v60 = vmul.f32 0.015625, %v2204_v50 }
 0x12a   : > { %1617 = vrsqrt.f32 %v981_v2  ;;  %v682_v21 = vpop.xlane.xlu0 %681  ;;  %v871_v24 = vmul.f32 %v2270_v40, %v2270_v40  ;;  %v879_v49 = vmul.f32 %v2273_v3, %v2273_v3  ;;  %v2295_v50 = vmul.f32 0.015625, %v2231_v37 }
 0x12b   : > { %v766_v27 = vmul.f32 0.015625, %v682_v21 }
 0x12c   : > { %v706_v1 = vpop.xlane.xlu1 %705 }
 0x12d   : > { %v774_v20 = vmul.f32 0.015625, %v706_v1  ;;  %v894_v41 = vsub.f32 %v766_v27, %v862_v31 }
 0x12e   : > { %v730_v34 = vpop.xlane.xlu0 %729 }
 0x12f   : > { %v782_v56 = vmul.f32 0.015625, %v730_v34  ;;  %v902_v54 = vsub.f32 %v774_v20, %v870_v11  ;;  %v926_v20 = vmax.f32 %v894_v41, 0.0 }
 0x130   : > { %v1612_v4 = vpop.eup %1611  ;;  %v754_v53 = vpop.xlane.xlu1 %753 }
 0x131   : > { %v1062_v52 = vrot.slane %v1612_v4, 4  ;;  %v910_v47 = vsub.f32 %v782_v56, %v878_v36  ;;  %v790_v16 = vmul.f32 0.015625, %v754_v53  ;;  %v934_v31 = vmax.f32 %v902_v54, 0.0 }
 0x132   : > { %v1614_v0 = vpop.eup %1613  ;;  %v685_v55 = vpop.xlane.xlu0 %684 }
 0x133   : > { %v2285_v38 = vsel %vm1063_vm4, %v1062_v52, %v2216_v48  ;;  %v1080_v51 = vrot.slane %v1614_v0, 4  ;;  %v942_v62 = vmax.f32 %v910_v47, 0.0  ;;  %v918_v58 = vsub.f32 %v790_v16, %v886_v46 }
 0x134   : > { %v767_v2 = vmul.f32 0.015625, %v685_v55  ;;  %v709_v21 = vpop.xlane.xlu1 %708  ;;  %v2298_v52 = vmul.f32 0.015625, %v2234_v57  ;;  %v958_v16 = vadd.f32 1e-06, %v926_v20 }
 0x135   : > { %v1616_v1 = vpop.eup %1615  ;;  %v2292_v27 = vsel %vm1063_vm4, %v1080_v51, %v2228_v42  ;;  %v775_v11 = vmul.f32 0.015625, %v709_v21  ;;  %v974_v36 = vadd.f32 1e-06, %v942_v62  ;;  %v950_v48 = vmax.f32 %v918_v58, 0.0 }
 0x136   : > { %v1094_v34 = vrot.slane %v1616_v1, 4  ;;  %v895_v56 = vsub.f32 %v767_v2, %v863_v28  ;;  %v733_v4 = vpop.xlane.xlu0 %732  ;;  %v966_v62 = vadd.f32 1e-06, %v934_v31  ;;  %v864_v21 = vmul.f32 %v2295_v50, %v2295_v50 }
 0x137   : > { %v1618_v53 = vpop.eup %1617  ;;  %v903_v47 = vsub.f32 %v775_v11, %v871_v24  ;;  %v783_v0 = vmul.f32 0.015625, %v733_v4  ;;  %1619 = vrsqrt.f32 %v974_v36  ;;  %v982_v54 = vadd.f32 1e-06, %v950_v48 }
 0x138   : > { %v1095_v42 = vsel %vm1063_vm4, %v1094_v34, %v2237_v14  ;;  %v1108_v41 = vrot.slane %v1618_v53, 4  ;;  %v757_v46 = vpop.xlane.xlu1 %756  ;;  %v927_v55 = vmax.f32 %v895_v56, 0.0  ;;  %v887_v24 = vmul.f32 %v2288_v60, %v2288_v60 }
 0x139   : > { %v935_v28 = vmax.f32 %v903_v47, 0.0  ;;  %v791_v51 = vmul.f32 0.015625, %v757_v46  ;;  %1621 = vrsqrt.f32 %v982_v54  ;;  %v911_v57 = vsub.f32 %v783_v0, %v879_v49 }
 0x13a   : > { %v1109_v37 = vsel %vm1063_vm4, %v1108_v41, %v2246_v12  ;;  %v688_v58 = vpop.xlane.xlu0 %687  ;;  %v2307_v14 = vmul.f32 0.015625, %v2241_v63  ;;  %v959_v2 = vadd.f32 1e-06, %v927_v55  ;;  %v872_v12 = vmul.f32 %v2298_v52, %v2298_v52 }
 0x13b   : > { %v967_v1 = vadd.f32 1e-06, %v935_v28  ;;  %v768_v20 = vmul.f32 0.015625, %v688_v58  ;;  %1623 = vrsqrt.f32 %v958_v16  ;;  %v919_v31 = vsub.f32 %v791_v51, %v887_v24 }
 0x13c   : > { %v712_v11 = vpop.xlane.xlu1 %711  ;;  %1625 = vrsqrt.f32 %v966_v62  ;;  %v943_v34 = vmax.f32 %v911_v57, 0.0  ;;  %v880_v48 = vmul.f32 %v2307_v14, %v2307_v14  ;;  %v2316_v46 = vmul.f32 0.015625, %v2243_v59 }
 0x13d   : > { %v776_v49 = vmul.f32 0.015625, %v712_v11  ;;  %v896_v36 = vsub.f32 %v768_v20, %v864_v21  ;;  %1627 = vrsqrt.f32 %v959_v2  ;;  %v951_v47 = vmax.f32 %v919_v31, 0.0 }
 0x13e   : > { %v736_v63 = vpop.xlane.xlu0 %735  ;;  %1629 = vrsqrt.f32 %v967_v1  ;;  %v975_v16 = vadd.f32 1e-06, %v943_v34  ;;  %v888_v24 = vmul.f32 %v2316_v46, %v2316_v46 }
 0x13f   : > { %v904_v56 = vsub.f32 %v776_v49, %v872_v12  ;;  %v784_v4 = vmul.f32 0.015625, %v736_v63  ;;  %v928_v53 = vmax.f32 %v896_v36, 0.0  ;;  %v983_v58 = vadd.f32 1e-06, %v951_v47 }
 0x140   : > { %v760_v54 = vpop.xlane.xlu1 %759 }
 0x141   : > { %v936_v0 = vmax.f32 %v904_v56, 0.0  ;;  %v912_v41 = vsub.f32 %v784_v4, %v880_v48  ;;  %v960_v55 = vadd.f32 1e-06, %v928_v53  ;;  %v792_v62 = vmul.f32 0.015625, %v760_v54 }
 0x143   : > { %v968_v28 = vadd.f32 1e-06, %v936_v0  ;;  %v944_v51 = vmax.f32 %v912_v41, 0.0  ;;  %1631 = vrsqrt.f32 %v960_v55  ;;  %v920_v11 = vsub.f32 %v792_v62, %v888_v24  ;;  %v1017_v41 = vld [vmem:[%s2497_s1] sm:$0xff] }
 0x144   : > { %v1620_v57 = vpop.eup %1619 }
 0x145   : > { %1633 = vrsqrt.f32 %v968_v28  ;;  %v1096_v2 = vrot.slane %v1620_v57, 3  ;;  %v976_v59 = vadd.f32 1e-06, %v944_v51  ;;  %v952_v36 = vmax.f32 %v920_v11, 0.0  ;;  %v1018_v51 = vld [vmem:[%s2497_s1 + $0x8] sm:$0xff] }
 0x146   : > { %1635 = vrsqrt.f32 %v975_v16  ;;  %v1622_v21 = vpop.eup %1621 }
 0x147   : > { %v2327_v1 = vsel %vm1066_vm5, %v1096_v2, %v1095_v42  ;;  %v1110_v20 = vrot.slane %v1622_v21, 3  ;;  %1637 = vrsqrt.f32 %v983_v58  ;;  %v984_v53 = vadd.f32 1e-06, %v952_v36 }
 0x148   : > { %v1624_v12 = vpop.eup %1623  ;;  %1639 = vrsqrt.f32 %v976_v59 }
 0x149   : > { %v2330_v31 = vsel %vm1066_vm5, %v1110_v20, %v1109_v37  ;;  %v1626_v49 = vpop.eup %1625  ;;  %v1065_v48 = vrot.slane %v1624_v12, 3  ;;  %1641 = vrsqrt.f32 %v984_v53 }
 0x14a   : > { %v1628_v34 = vpop.eup %1627  ;;  %v1082_v42 = vrot.slane %v1626_v49, 3 }
 0x14b   : > { %v1630_v63 = vpop.eup %1629  ;;  %v1068_v56 = vrot.slane %v1628_v34, 2  ;;  %v1067_v0 = vsel %vm1066_vm5, %v1065_v48, %v2285_v38 }
 0x14c   : > { %v1084_v4 = vrot.slane %v1630_v63, 2  ;;  %v1083_v55 = vsel %vm1066_vm5, %v1082_v42, %v2292_v27 }
 0x14d   : > { %v1070_v28 = vsel %vm1069_vm6, %v1068_v56, %v1067_v0 }
 0x14e   : > { %v1085_v57 = vsel %vm1069_vm6, %v1084_v4, %v1083_v55 }
 0x150   : > { %v1632_v47 = vpop.eup %1631 }
 0x151   : > { %v1071_v54 = vrot.slane %v1632_v47, 1 }
 0x152   : > { %v1634_v37 = vpop.eup %1633 }
 0x153   : > { %v2340_v16 = vpop.eup %1635  ;;  %v1086_v62 = vrot.slane %v1634_v37, 1  ;;  %v1073_v38 = vsel %vm1072_vm7, %v1071_v54, %v1070_v28 }
 0x154   : > { %v1120_v27 = vmul.f32 %v1073_v38, %v1017_v41  ;;  %v2358_v24 = vpop.eup %1637  ;;  %v1098_v2 = vrot.slane %v2340_v16, 2 }
 0x155   : > { %v1087_v58 = vsel %vm1072_vm7, %v1086_v62, %v1085_v57  ;;  %v2361_v21 = vpop.eup %1639  ;;  %v1112_v47 = vrot.slane %v2358_v24, 2 }
 0x156   : > { %v1121_v59 = vmul.f32 %v1087_v58, %v1018_v51  ;;  %1125 = vst.msk [vmem:[%s2354_s5] sm:$0xff] %vm1124_vm8, %v1120_v27  ;;  %v1137_v20 = vrot.slane %v1120_v27, 1  ;;  %v1138_v11 = vrot.slane %v1120_v27, 2  ;;  %v1139_v12 = vrot.slane %v1120_v27, 3 }
 0x157   : > { %v1140_v49 = vrot.slane %v1120_v27, 4  ;;  %v1141_v34 = vrot.slane %v1120_v27, 5  ;;  %v1142_v36 = vrot.slane %v1120_v27, 6  ;;  %v1143_v63 = vrot.slane %v1120_v27, 7 }
 0x158   : > { %v1197_v48 = vmul.f32 %v1120_v27, %v2156_v61  ;;  %1126 = vst.msk [vmem:[%s2354_s5 + $0x8] sm:$0xff] %vm1124_vm8, %v1121_v59  ;;  %v1198_v42 = vmul.f32 %v1137_v20, %v2102_v18  ;;  %v1199_v56 = vmul.f32 %v1138_v11, %v2132_v10  ;;  %v1200_v4 = vmul.f32 %v1139_v12, %v2158_v39 }
 0x159   : > { %v1201_v53 = vmul.f32 %v1140_v49, %v2197_v22  ;;  %v1202_v37 = vmul.f32 %v1141_v34, %v2249_v17  ;;  %v1203_v0 = vmul.f32 %v1142_v36, %v2265_v35  ;;  %v1100_v41 = vrot.slane %v2361_v21, 1  ;;  %v1642_v34 = vpop.eup %1641 }
 0x15a   : > { %v1204_v61 = vmul.f32 %v1143_v63, %v2295_v50  ;;  %v1261_v54 = vrot.slane %v1198_v42, 7  ;;  %v1263_v16 = vrot.slane %v1199_v56, 6  ;;  %v1144_v55 = vrot.slane %v1121_v59, 1  ;;  %v1019_v42 = vld [vmem:[%s2497_s1 + $0x10] sm:$0xff] }
 0x15b   : > { %v1265_v18 = vrot.slane %v1200_v4, 5  ;;  %v1267_v28 = vrot.slane %v1201_v53, 4  ;;  %v1269_v10 = vrot.slane %v1202_v37, 3  ;;  %v1145_v51 = vrot.slane %v1121_v59, 2 }
 0x15c   : > { %v1262_v39 = vsel %vm1054_vm1, %v1261_v54, %v1197_v48  ;;  %v1146_v22 = vrot.slane %v1121_v59, 3  ;;  %v1147_v62 = vrot.slane %v1121_v59, 4  ;;  %v1148_v57 = vrot.slane %v1121_v59, 5 }
 0x15d   : > { %v1264_v17 = vsel %vm1057_vm2, %v1263_v16, %v1262_v39  ;;  %v1149_v38 = vrot.slane %v1121_v59, 6  ;;  %v1150_v35 = vrot.slane %v1121_v59, 7  ;;  %v1205_v27 = vmul.f32 %v1121_v59, %v2162_v43  ;;  %v1129_v43 = vld [vmem:[%s2498_s2] sm:$0xff] }
 0x15e   : > { %v1266_v50 = vsel %vm1060_vm3, %v1265_v18, %v1264_v17  ;;  %v1206_v58 = vmul.f32 %v1144_v55, %v2106_v8  ;;  %v1207_v24 = vmul.f32 %v1145_v51, %v2136_v7  ;;  %v1208_v21 = vmul.f32 %v1146_v22, %v2164_v44 }
 0x15f   : > { %v1268_v20 = vsel %vm1063_vm4, %v1267_v28, %v1266_v50  ;;  %v1271_v11 = vrot.slane %v1203_v0, 2  ;;  %v1273_v12 = vrot.slane %v1204_v61, 1  ;;  %v1209_v49 = vmul.f32 %v1147_v62, %v2202_v30  ;;  %v1020_v50 = vld [vmem:[%s2497_s1 + $0x18] sm:$0xff] }
 0x160   : > { %v1270_v59 = vsel %vm1066_vm5, %v1269_v10, %v1268_v20  ;;  %v1210_v8 = vmul.f32 %v1148_v57, %v2252_v19  ;;  %v1275_v36 = vrot.slane %v1206_v58, 7  ;;  %v1277_v7 = vrot.slane %v1207_v24, 6 }
 0x161   : > { %v1099_v44 = vsel %vm1069_vm6, %v1098_v2, %v2327_v1  ;;  %v1272_v63 = vsel %vm1069_vm6, %v1271_v11, %v1270_v59  ;;  %v1211_v48 = vmul.f32 %v1149_v38, %v2270_v40  ;;  %v1212_v30 = vmul.f32 %v1150_v35, %v2298_v52 }
 0x162   : > { %v1274_v19 = vsel %vm1072_vm7, %v1273_v12, %v1272_v63  ;;  %v1276_v1 = vsel %vm1054_vm1, %v1275_v36, %v1205_v27  ;;  %v1279_v2 = vrot.slane %v1208_v21, 5  ;;  %v1281_v56 = vrot.slane %v1209_v49, 4 }
 0x163   : > { %v1321_v40 = vsub.f32 %v1129_v43, %v1274_v19  ;;  %v1278_v52 = vsel %vm1057_vm2, %v1277_v7, %v1276_v1  ;;  %v1101_v4 = vsel %vm1072_vm7, %v1100_v41, %v1099_v44  ;;  %v1114_v53 = vrot.slane %v1642_v34, 1  ;;  %v1130_v41 = vld [vmem:[%s2498_s2 + $0x8] sm:$0xff] }
 0x164   : > { %v1113_v37 = vsel %vm1069_vm6, %v1112_v47, %v2330_v31  ;;  %v1280_v0 = vsel %vm1060_vm3, %v1279_v2, %v1278_v52  ;;  %v1283_v61 = vrot.slane %v1210_v8, 3  ;;  %v1122_v54 = vmul.f32 %v1101_v4, %v1019_v42  ;;  %v1131_v2 = vld [vmem:[%s2498_s2 + $0x10] sm:$0xff] }
 0x165   : > { %1325 = vst.msk [vmem:[%s2404_s12] sm:$0xff] %vm1124_vm8, %v1321_v40  ;;  %v1282_v16 = vsel %vm1063_vm4, %v1281_v56, %v1280_v0  ;;  %v1285_v55 = vrot.slane %v1211_v48, 2  ;;  %v1287_v18 = vrot.slane %v1212_v30, 1  ;;  %v1115_v28 = vsel %vm1072_vm7, %v1114_v53, %v1113_v37 }
 0x166   : > { %v1284_v10 = vsel %vm1066_vm5, %v1283_v61, %v1282_v16  ;;  %1127 = vst.msk [vmem:[%s2354_s5 + $0x10] sm:$0xff] %vm1124_vm8, %v1122_v54  ;;  %v1151_v31 = vrot.slane %v1122_v54, 1  ;;  %v1152_v47 = vrot.slane %v1122_v54, 2  ;;  %v1153_v51 = vrot.slane %v1122_v54, 3 }
 0x167   : > { %v1286_v39 = vsel %vm1069_vm6, %v1285_v55, %v1284_v10  ;;  %v1154_v22 = vrot.slane %v1122_v54, 4  ;;  %v1155_v62 = vrot.slane %v1122_v54, 5  ;;  %v1156_v57 = vrot.slane %v1122_v54, 6 }
 0x168   : > { %v1288_v17 = vsel %vm1072_vm7, %v1287_v18, %v1286_v39  ;;  %v1157_v38 = vrot.slane %v1122_v54, 7  ;;  %v1213_v35 = vmul.f32 %v1122_v54, %v2166_v5  ;;  %v1214_v27 = vmul.f32 %v1151_v31, %v2110_v32 }
 0x169   : > { %v1322_v58 = vsub.f32 %v1130_v41, %v1288_v17  ;;  %v1215_v24 = vmul.f32 %v1152_v47, %v2140_v15  ;;  %v1216_v21 = vmul.f32 %v1153_v51, %v2168_v45  ;;  %v1217_v20 = vmul.f32 %v1154_v22, %v2211_v6 }
 0x16a   : > { %v1218_v11 = vmul.f32 %v1155_v62, %v2255_v25  ;;  %v1219_v12 = vmul.f32 %v1156_v57, %v2273_v3  ;;  %v1220_v5 = vmul.f32 %v1157_v38, %v2307_v14  ;;  %v1289_v49 = vrot.slane %v1214_v27, 7 }
 0x16b   : > { %1326 = vst.msk [vmem:[%s2404_s12 + $0x8] sm:$0xff] %vm1124_vm8, %v1322_v58  ;;  %v1291_v32 = vrot.slane %v1215_v24, 6  ;;  %v1293_v34 = vrot.slane %v1216_v21, 5  ;;  %v1295_v43 = vrot.slane %v1217_v20, 4  ;;  %v1123_v59 = vmul.f32 %v1115_v28, %v1020_v50 }
 0x16c   : > { %v1290_v15 = vsel %vm1054_vm1, %v1289_v49, %v1213_v35  ;;  %v1297_v8 = vrot.slane %v1218_v11, 3  ;;  %v1299_v45 = vrot.slane %v1219_v12, 2  ;;  %v1301_v36 = vrot.slane %v1220_v5, 1 }
 0x16d   : > { %v1292_v6 = vsel %vm1057_vm2, %v1291_v32, %v1290_v15  ;;  %1128 = vst.msk [vmem:[%s2354_s5 + $0x18] sm:$0xff] %vm1124_vm8, %v1123_v59  ;;  %v1158_v25 = vrot.slane %v1123_v59, 1  ;;  %v1159_v3 = vrot.slane %v1123_v59, 2  ;;  %v1160_v7 = vrot.slane %v1123_v59, 3 }
 0x16e   : > { %v1294_v14 = vsel %vm1060_vm3, %v1293_v34, %v1292_v6  ;;  %v1161_v44 = vrot.slane %v1123_v59, 4  ;;  %v1162_v63 = vrot.slane %v1123_v59, 5  ;;  %v1163_v48 = vrot.slane %v1123_v59, 6 }
 0x16f   : > { %v1296_v30 = vsel %vm1063_vm4, %v1295_v43, %v1294_v14  ;;  %v1164_v42 = vrot.slane %v1123_v59, 7  ;;  %v1221_v19 = vmul.f32 %v1123_v59, %v2183_v13  ;;  %v1222_v1 = vmul.f32 %v1158_v25, %v2114_v29 }
 0x170   : > { %v1298_v56 = vsel %vm1066_vm5, %v1297_v8, %v1296_v30  ;;  %v1223_v40 = vmul.f32 %v1159_v3, %v2144_v23  ;;  %v1224_v52 = vmul.f32 %v1160_v7, %v2186_v26  ;;  %v1225_v4 = vmul.f32 %v1161_v44, %v2220_v9 }
 0x171   : > { %v1300_v53 = vsel %vm1069_vm6, %v1299_v45, %v1298_v56  ;;  %v1226_v37 = vmul.f32 %v1162_v63, %v2262_v33  ;;  %v1303_v29 = vrot.slane %v1222_v1, 7  ;;  %v1227_v54 = vmul.f32 %v1163_v48, %v2288_v60  ;;  %v1132_v60 = vld [vmem:[%s2498_s2 + $0x18] sm:$0xff] }
 0x172   : > { %v1302_v13 = vsel %vm1072_vm7, %v1301_v36, %v1300_v53  ;;  %v1305_v0 = vrot.slane %v1223_v40, 6  ;;  %v1228_v16 = vmul.f32 %v1164_v42, %v2316_v46  ;;  %v1307_v55 = vrot.slane %v1224_v52, 5 }
 0x173   : > { %v1323_v61 = vsub.f32 %v1131_v2, %v1302_v13  ;;  %v1304_v23 = vsel %vm1054_vm1, %v1303_v29, %v1221_v19  ;;  %v1309_v9 = vrot.slane %v1225_v4, 4  ;;  %v1311_v18 = vrot.slane %v1226_v37, 3 }
 0x174   : > { %v1306_v26 = vsel %vm1057_vm2, %v1305_v0, %v1304_v23  ;;  %v1313_v41 = vrot.slane %v1227_v54, 2  ;;  %v1315_v10 = vrot.slane %v1228_v16, 1 }
 0x175   : > { %1327 = vst.msk [vmem:[%s2404_s12 + $0x10] sm:$0xff] %vm1124_vm8, %v1323_v61  ;;  %v1308_v33 = vsel %vm1060_vm3, %v1307_v55, %v1306_v26 }
 0x176   : > { %v1310_v28 = vsel %vm1063_vm4, %v1309_v9, %v1308_v33 }
 0x177   : > { %v1312_v46 = vsel %vm1066_vm5, %v1311_v18, %v1310_v28 }
 0x178   : > { %v1314_v31 = vsel %vm1069_vm6, %v1313_v41, %v1312_v46 }
 0x179   : > { %v1316_v47 = vsel %vm1072_vm7, %v1315_v10, %v1314_v31 }
 0x17a   : > { %v1324_v51 = vsub.f32 %v1132_v60, %v1316_v47 }
 0x17c   : > { %1328 = vst.msk [vmem:[%s2404_s12 + $0x18] sm:$0xff] %vm1124_vm8, %v1324_v51 }
 0x17d PF: > { %s18_s22 = sadd.s32 1, %s1737_s22   ;;  %s2506_s27 = sld [smem:[#allocation5_spill]] }
 0x17e   : > { %p15_p10 = scmp.ge.s32.totalorder %s18_s22, 6   ;;  %s2507_s15 = smov %s1713_s16 }
 0x17f   : > { %s2508_s16 = smov %s1717_s17  ;;  %s2509_s17 = smov %s1835_s9 }
 0x180   : > { %s2510_s18 = smov %s1729_s20  ;;  %s2511_s19 = smov %s1733_s21 }
 0x181   : > { %s2513_s21 = smov %s2519_s25  ;;  %17 = sbr.rel (!%p15_p10) target bundleno = 5 (0x5), region = 84 }
 0x183   : > { %s2512_s20 = smov %s2506_s27 }
 0x186   :  { %1382 = vsyncpa [#allocation3], 1 }
 0x187   :  { %1384 = vsyncpa [#allocation3 + $0x1], 1 }

</bundles_post_ra>
